<compile_context>
chip_gen: v7x
topology: tpu7x:2x2x1
jax: 0.10.0
libtpu: 0.0.40
codegen_flags: <defaults>
</compile_context>

<pallas_src>
import functools

import jax
import jax.numpy as jnp
from jax import lax
from jax.experimental import pallas as pl
from jax.experimental.pallas import tpu as pltpu

H1, H2 = 64, 32   # hidden widths from the PyTorch module
_LANE = 128


def _mlp_kernel(x_ref, w1_ref, b1_ref, w2_ref, b2_ref, w3_ref, b3_ref, o_ref):
    """Fused 3-layer MLP on one (block_b, nn_in) batch tile, entirely in VMEM.

    All intermediates are kept feature-major (feature, block_b): the batch dim sits on
    the 128-lane axis, so activations run on lane-dense vregs and the result comes off
    the MXU already in the lane-dense (nn_out, block_b) output layout (no XLU .T).
    """
    x = x_ref[...]                                   # (bb, nn_in)

    # Layer 1: Linear(nn_in, 64) + LeakyReLU(0.01).
    # w1 is (H1, nn_in) (PyTorch layout); NT dot -> (H1, bb), f32 MXU accumulation.
    h1 = lax.dot_general(w1_ref[...], x,
                         dimension_numbers=(((1,), (1,)), ((), ())),
                         preferred_element_type=jnp.float32)
    h1 = h1 + b1_ref[...].astype(jnp.float32)        # (H1, 1) broadcast over lanes
    h1 = jnp.maximum(h1, 0.01 * h1)                  # LeakyReLU, single VALU op

    # Layer 2: Linear(64, 32) + exact Sigmoid.  w2 is (H2, H1): plain NN matmul.
    h2 = jnp.dot(w2_ref[...], h1.astype(w2_ref.dtype),
                 preferred_element_type=jnp.float32)
    h2 = h2 + b2_ref[...].astype(jnp.float32)
    h2 = 1.0 / (1.0 + jnp.exp(-h2))                  # exact sigmoid (not EUP-bound)

    # Layer 3: Linear(32, nn_out).  w3 is (nn_out, H2).
    out = jnp.dot(w3_ref[...], h2.astype(w3_ref.dtype),
                  preferred_element_type=jnp.float32)
    out = out + b3_ref[...].astype(jnp.float32)

    o_ref[...] = out.astype(o_ref.dtype)             # already lane-dense (nn_out, bb)


def _round_up(v, m):
    return ((v + m - 1) // m) * m


def _vmem_cap_bytes():
    """Generation-aware VMEM budget: ~3/4 of physical capacity, capped below 100 MiB."""
    phys = 64 * 1024 * 1024                          # v7x-safe fallback
    try:
        phys = int(pltpu.get_tpu_info().vmem_capacity_bytes)
    except Exception:
        pass
    return min((phys * 3) // 4, 100 * 1024 * 1024)


def _vmem_estimate(bb, nn_in, nn_out, cd_size, out_size):
    """Rough per-grid-step VMEM footprint, counting real lane/sublane padding."""
    x_blk = 2 * bb * _round_up(nn_in, _LANE) * cd_size              # double-buffered x
    o_blk = 2 * _round_up(nn_out, 8) * bb * out_size                # double-buffered out
    w_blk = 2 * cd_size * (H1 * _round_up(nn_in, _LANE)
                           + H2 * _round_up(H1, _LANE)
                           + _round_up(nn_out, 8) * _round_up(H2, _LANE)
                           + (H1 + H2 + _round_up(nn_out, 8)) * _LANE)
    inter = bb * (H1 + H2 + _round_up(nn_out, 8)) * 4               # f32 intermediates
    return x_blk + o_blk + w_blk + inter


@functools.partial(jax.jit,
                   static_argnames=("block_b", "compute_dtype", "transpose_output"))
def fc_wave_forward(x, params, *, block_b=8192, compute_dtype=jnp.bfloat16,
                    transpose_output=True):
    """x: (B, nn_in). params: w1 (64,nn_in), w2 (32,64), w3 (nn_out,32) in PyTorch
    (out, in) layout, biases 1-D.

    block_b: batch tile (rounded to a multiple of 128; sweep 4096-32768 for large B).
    compute_dtype: jnp.bfloat16 (default, halves streaming traffic) or jnp.float32.
    transpose_output: True -> (B, nn_out) like the PyTorch module; False -> lane-dense
      (nn_out, B) with no wrapper-side transpose (use when the consumer can take it).
    """
    B, nn_in = x.shape
    nn_out = params["w3"].shape[0]
    out_dtype = x.dtype
    cd_size = jnp.dtype(compute_dtype).itemsize
    out_size = jnp.dtype(out_dtype).itemsize

    # ---- Tile selection: large, 128-aligned batch tiles; >=2 grid steps when B
    # allows it so a 2-TensorCore part (v7x) uses both cores.
    if B <= 128:
        bb = 128
    elif B <= block_b:
        bb = _round_up((B + 1) // 2, 128)
    else:
        bb = _round_up(block_b, 128)

    # Auto-shrink the tile if its padding-aware footprint would not fit the budget.
    cap = _vmem_cap_bytes()
    while bb > 128 and (3 * _vmem_estimate(bb, nn_in, nn_out, cd_size, out_size)) // 2 > cap:
        bb = max(128, _round_up(bb // 2, 128))

    b_pad = _round_up(B, bb)
    grid = (b_pad // bb,)

    # Pad batch so every grid step is a full tile (no masked edge tile).
    xc = x.astype(compute_dtype)
    if b_pad != B:
        xc = jnp.pad(xc, ((0, b_pad - B), (0, 0)))

    w1 = params["w1"].astype(compute_dtype)                  # (H1, nn_in)
    w2 = params["w2"].astype(compute_dtype)                  # (H2, H1)
    w3 = params["w3"].astype(compute_dtype)                  # (nn_out, H2)
    b1 = params["b1"].astype(compute_dtype).reshape(H1, 1)
    b2 = params["b2"].astype(compute_dtype).reshape(H2, 1)
    b3 = params["b3"].astype(compute_dtype).reshape(nn_out, 1)

    est = _vmem_estimate(bb, nn_in, nn_out, cd_size, out_size)
    vmem_limit = int(min(max((3 * est) // 2, 8 * 1024 * 1024), cap))

    weight_bytes = (nn_in * H1 + H1 * H2 + H2 * nn_out + H1 + H2 + nn_out) * cd_size
    cost = pl.CostEstimate(
        flops=2 * b_pad * (nn_in * H1 + H1 * H2 + H2 * nn_out),
        transcendentals=b_pad * H2,                          # exact sigmoid: one exp
        bytes_accessed=b_pad * nn_in * cd_size + b_pad * nn_out * out_size + weight_bytes,
    )

    def whole_spec(r, c):
        return pl.BlockSpec((r, c), lambda i: (0, 0))

    out_t = pl.pallas_call(
        _mlp_kernel,
        out_shape=jax.ShapeDtypeStruct((nn_out, b_pad), out_dtype),
        grid_spec=pltpu.PrefetchScalarGridSpec(
            num_scalar_prefetch=0,
            grid=grid,
            in_specs=[
                pl.BlockSpec((bb, nn_in), lambda i: (i, 0)),   # x tile (bb, nn_in)
                whole_spec(H1, nn_in),                         # w1
                whole_spec(H1, 1),                             # b1
                whole_spec(H2, H1),                            # w2
                whole_spec(H2, 1),                             # b2
                whole_spec(nn_out, H2),                        # w3
                whole_spec(nn_out, 1),                         # b3
            ],
            # Lane-dense output tile: (nn_out, bb) with batch on the 128-lane axis.
            out_specs=pl.BlockSpec((nn_out, bb), lambda i: (0, i)),
        ),
        compiler_params=pltpu.CompilerParams(
            dimension_semantics=("parallel",),
            vmem_limit_bytes=vmem_limit,
        ),
        cost_estimate=cost,
    )(xc, w1, b1, w2, b2, w3, b3)

    if b_pad != B:
        out_t = out_t[:, :B]
    # Module semantics want (B, nn_out); feature-major consumers can skip this.
    return out_t.T if transpose_output else out_t


def init_fc_wave_params(key, nn_in, nn_out, dtype=jnp.float32):
    """nn.Linear-style init (uniform +/- 1/sqrt(fan_in)); PyTorch (out, in) layout."""
    dims = [(nn_in, H1), (H1, H2), (H2, nn_out)]
    params = {}
    for idx, (fin, fout) in enumerate(dims, start=1):
        key, kw, kb = jax.random.split(key, 3)
        bound = 1.0 / (fin ** 0.5)
        params[f"w{idx}"] = jax.random.uniform(
            kw, (fout, fin), dtype=dtype, minval=-bound, maxval=bound)
        params[f"b{idx}"] = jax.random.uniform(
            kb, (fout,), dtype=dtype, minval=-bound, maxval=bound)
    return params


def fc_wave_reference(x, params):
    """Pure-JAX high-precision reference matching the PyTorch module."""
    dot = lambda a, b: jnp.dot(a, b, precision=jax.lax.Precision.HIGHEST)
    h = dot(x, params["w1"].T) + params["b1"]
    h = jnp.where(h > 0, h, 0.01 * h)
    h = dot(h, params["w2"].T) + params["b2"]
    h = jax.nn.sigmoid(h)
    return dot(h, params["w3"].T) + params["b3"]


if __name__ == "__main__":
    key = jax.random.PRNGKey(0)
    nn_in, nn_out = 16, 8

    key, kx = jax.random.split(key)
    params = init_fc_wave_params(key, nn_in, nn_out)

    # Small shape consistent with the module: batch=8, nn_in=16, nn_out=8; f32 path.
    x_small = jax.random.normal(kx, (8, nn_in), dtype=jnp.float32)
    out_small = jax.block_until_ready(
        fc_wave_forward(x_small, params, compute_dtype=jnp.float32))
    ref_small = fc_wave_reference(x_small, params)
    assert out_small.shape == (8, nn_out)
    assert jnp.allclose(out_small, ref_small, atol=5e-3, rtol=5e-3), "f32 mismatch"

    # Larger batch: exercises the multi-tile grid, wrapper padding, and the lane-dense
    # feature-major output path.
    key, kx2 = jax.random.split(key)
    x_big = jax.random.normal(kx2, (300, nn_in), dtype=jnp.float32)
    out_big = jax.block_until_ready(
        fc_wave_forward(x_big, params, block_b=128, compute_dtype=jnp.float32))
    ref_big = fc_wave_reference(x_big, params)
    assert out_big.shape == (300, nn_out)
    assert jnp.allclose(out_big, ref_big, atol=5e-3, rtol=5e-3), "tiled mismatch"

    # Default bf16-streaming path (f32 MXU accumulation); loose tolerance.
    out_bf16 = jax.block_until_ready(fc_wave_forward(x_big, params, block_b=128))
    assert jnp.allclose(out_bf16, ref_big, atol=1e-1, rtol=1e-1), "bf16 mismatch"

    # Feature-major output (no wrapper-side transpose) for consumers that accept it.
    out_fm = jax.block_until_ready(
        fc_wave_forward(x_big, params, compute_dtype=jnp.float32,
                        transpose_output=False))
    assert out_fm.shape == (nn_out, 300)
    assert jnp.allclose(out_fm.T, ref_big, atol=5e-3, rtol=5e-3), "feature-major mismatch"

    print("KERNEL_OK")
</pallas_src>

<mosaic_0001>
module attributes {stable_mosaic.version = 11 : i64} {
  func.func @_mlp_kernel(%arg0: i32, %arg1: memref<128x16xf32, #tpu.memory_space<vmem>>, %arg2: memref<64x16xf32, #tpu.memory_space<vmem>>, %arg3: memref<64x1xf32, #tpu.memory_space<vmem>>, %arg4: memref<32x64xf32, #tpu.memory_space<vmem>>, %arg5: memref<32x1xf32, #tpu.memory_space<vmem>>, %arg6: memref<8x32xf32, #tpu.memory_space<vmem>>, %arg7: memref<8x1xf32, #tpu.memory_space<vmem>>, %arg8: memref<8x128xf32, #tpu.memory_space<vmem>>) attributes {dimension_semantics = [#tpu.dimension_semantics<parallel>], iteration_bounds = array<i64: 1>, scalar_prefetch = 0 : i64, scratch_operands = 0 : i64, tpu.core_type = #tpu.core_type<tc>, window_params = [{transform_indices = @transform_0, window_bounds = array<i64: 128, 16>}, {pipeline_mode = #tpu.pipeline_mode<synchronous>, transform_indices = @transform_1, window_bounds = array<i64: 64, 16>}, {pipeline_mode = #tpu.pipeline_mode<synchronous>, transform_indices = @transform_2, window_bounds = array<i64: 64, 1>}, {pipeline_mode = #tpu.pipeline_mode<synchronous>, transform_indices = @transform_3, window_bounds = array<i64: 32, 64>}, {pipeline_mode = #tpu.pipeline_mode<synchronous>, transform_indices = @transform_4, window_bounds = array<i64: 32, 1>}, {pipeline_mode = #tpu.pipeline_mode<synchronous>, transform_indices = @transform_5, window_bounds = array<i64: 8, 32>}, {pipeline_mode = #tpu.pipeline_mode<synchronous>, transform_indices = @transform_6, window_bounds = array<i64: 8, 1>}, {transform_indices = @transform_7, window_bounds = array<i64: 8, 128>}]} {
    %c0 = arith.constant 0 : index
    %c0_0 = arith.constant 0 : index
    %0 = vector.load %arg1[%c0, %c0_0] : memref<128x16xf32, #tpu.memory_space<vmem>>, vector<128x16xf32>
    %c0_1 = arith.constant 0 : index
    %c0_2 = arith.constant 0 : index
    %1 = vector.load %arg2[%c0_1, %c0_2] : memref<64x16xf32, #tpu.memory_space<vmem>>, vector<64x16xf32>
    %cst = arith.constant dense<0.000000e+00> : vector<64x128xf32>
    %2 = tpu.matmul %1, %0, %cst {dimension_numbers = #tpu.dot_dimension_numbers<[1], [1], [0], [0], [0, 0, 1, 0], [], []>} : vector<64x16xf32>, vector<128x16xf32>, vector<64x128xf32> -> vector<64x128xf32>
    %c0_3 = arith.constant 0 : index
    %c0_4 = arith.constant 0 : index
    %3 = vector.load %arg3[%c0_3, %c0_4] : memref<64x1xf32, #tpu.memory_space<vmem>>, vector<64x1xf32>
    %4 = vector.broadcast %3 : vector<64x1xf32> to vector<64x128xf32>
    %5 = arith.addf %2, %4 : vector<64x128xf32>
    %cst_5 = arith.constant 0.00999999977 : f32
    %6 = vector.broadcast %cst_5 : f32 to vector<64x128xf32>
    %7 = arith.mulf %6, %5 : vector<64x128xf32>
    %8 = arith.maximumf %5, %7 : vector<64x128xf32>
    %c0_6 = arith.constant 0 : index
    %c0_7 = arith.constant 0 : index
    %9 = vector.load %arg4[%c0_6, %c0_7] : memref<32x64xf32, #tpu.memory_space<vmem>>, vector<32x64xf32>
    %cst_8 = arith.constant dense<0.000000e+00> : vector<32x128xf32>
    %10 = tpu.matmul %9, %8, %cst_8 {dimension_numbers = #tpu.dot_dimension_numbers<[1], [0], [0], [1], [0, 0, 1, 1], [], []>} : vector<32x64xf32>, vector<64x128xf32>, vector<32x128xf32> -> vector<32x128xf32>
    %c0_9 = arith.constant 0 : index
    %c0_10 = arith.constant 0 : index
    %11 = vector.load %arg5[%c0_9, %c0_10] : memref<32x1xf32, #tpu.memory_space<vmem>>, vector<32x1xf32>
    %12 = vector.broadcast %11 : vector<32x1xf32> to vector<32x128xf32>
    %13 = arith.addf %10, %12 : vector<32x128xf32>
    %cst_11 = arith.constant 0.000000e+00 : f32
    %14 = vector.broadcast %cst_11 : f32 to vector<32x128xf32>
    %15 = arith.subf %14, %13 : vector<32x128xf32>
    %16 = math.exp %15 : vector<32x128xf32>
    %cst_12 = arith.constant 1.000000e+00 : f32
    %17 = vector.broadcast %cst_12 : f32 to vector<32x128xf32>
    %18 = arith.addf %17, %16 : vector<32x128xf32>
    %cst_13 = arith.constant 1.000000e+00 : f32
    %19 = vector.broadcast %cst_13 : f32 to vector<32x128xf32>
    %20 = arith.divf %19, %18 : vector<32x128xf32>
    %c0_14 = arith.constant 0 : index
    %c0_15 = arith.constant 0 : index
    %21 = vector.load %arg6[%c0_14, %c0_15] : memref<8x32xf32, #tpu.memory_space<vmem>>, vector<8x32xf32>
    %cst_16 = arith.constant dense<0.000000e+00> : vector<8x128xf32>
    %22 = tpu.matmul %21, %20, %cst_16 {dimension_numbers = #tpu.dot_dimension_numbers<[1], [0], [0], [1], [0, 0, 1, 1], [], []>} : vector<8x32xf32>, vector<32x128xf32>, vector<8x128xf32> -> vector<8x128xf32>
    %c0_17 = arith.constant 0 : index
    %c0_18 = arith.constant 0 : index
    %23 = vector.load %arg7[%c0_17, %c0_18] : memref<8x1xf32, #tpu.memory_space<vmem>>, vector<8x1xf32>
    %24 = vector.broadcast %23 : vector<8x1xf32> to vector<8x128xf32>
    %25 = arith.addf %22, %24 : vector<8x128xf32>
    %c0_19 = arith.constant 0 : index
    %c0_20 = arith.constant 0 : index
    %26 = vector.load %arg8[%c0_19, %c0_20] : memref<8x128xf32, #tpu.memory_space<vmem>>, vector<8x128xf32>
    tpu.vector_store %arg8[%c0_19, %c0_20], %25 {strides = array<i32>} : memref<8x128xf32, #tpu.memory_space<vmem>>, vector<8x128xf32>,
    return
  }
  func.func @transform_0(%arg0: i32) -> (i32, i32) {
    %c0_i32 = arith.constant 0 : i32
    %c0_i32_0 = arith.constant 0 : i32
    return %arg0, %c0_i32 : i32, i32
  }
  func.func @transform_1(%arg0: i32) -> (i32, i32) {
    %c0_i32 = arith.constant 0 : i32
    %c0_i32_0 = arith.constant 0 : i32
    %c0_i32_1 = arith.constant 0 : i32
    return %c0_i32, %c0_i32_0 : i32, i32
  }
  func.func @transform_2(%arg0: i32) -> (i32, i32) {
    %c0_i32 = arith.constant 0 : i32
    %c0_i32_0 = arith.constant 0 : i32
    %c0_i32_1 = arith.constant 0 : i32
    return %c0_i32, %c0_i32_0 : i32, i32
  }
  func.func @transform_3(%arg0: i32) -> (i32, i32) {
    %c0_i32 = arith.constant 0 : i32
    %c0_i32_0 = arith.constant 0 : i32
    %c0_i32_1 = arith.constant 0 : i32
    return %c0_i32, %c0_i32_0 : i32, i32
  }
  func.func @transform_4(%arg0: i32) -> (i32, i32) {
    %c0_i32 = arith.constant 0 : i32
    %c0_i32_0 = arith.constant 0 : i32
    %c0_i32_1 = arith.constant 0 : i32
    return %c0_i32, %c0_i32_0 : i32, i32
  }
  func.func @transform_5(%arg0: i32) -> (i32, i32) {
    %c0_i32 = arith.constant 0 : i32
    %c0_i32_0 = arith.constant 0 : i32
    %c0_i32_1 = arith.constant 0 : i32
    return %c0_i32, %c0_i32_0 : i32, i32
  }
  func.func @transform_6(%arg0: i32) -> (i32, i32) {
    %c0_i32 = arith.constant 0 : i32
    %c0_i32_0 = arith.constant 0 : i32
    %c0_i32_1 = arith.constant 0 : i32
    return %c0_i32, %c0_i32_0 : i32, i32
  }
  func.func @transform_7(%arg0: i32) -> (i32, i32) {
    %c0_i32 = arith.constant 0 : i32
    %c0_i32_0 = arith.constant 0 : i32
    return %c0_i32, %arg0 : i32, i32
  }
}

</mosaic_0001>

<bundles_post_ra>
// kernel: fc_wave_forward.1
= control target key start
LH: loop header
LB: loop body
LE: loop exit
PB: predicated region body
PF: predicated region fallthrough
CT: control target
= control target key end

     0   :  { %vm98_vm0 = vcmask 130048   ;;  %v767_v3 = vmov 0   ;;  %vm320_vm2 = vcmask 523264   ;;  %vm769_vm3 = vmmov 0   ;;  %s990_s0 = inlined_call_operand.vmem [shape: f32[128,16], index: 0, kind: input, shape index: {}]   ;;  %s991_s1 = inlined_call_operand.vmem [shape: f32[64,16], index: 1, kind: input, shape index: {}]   ;;  %s992_s2 = inlined_call_operand.vmem [shape: f32[64,1], index: 2, kind: input, shape index: {}]   ;;  %s993_s4 = inlined_call_operand.vmem [shape: f32[32,1], index: 4, kind: input, shape index: {}]   ;;  %s994_s6 = inlined_call_operand.vmem [shape: f32[8,1], index: 6, kind: input, shape index: {}]   ;;  %s995_s3 = inlined_call_operand.vmem [shape: f32[32,64], index: 3, kind: input, shape index: {}]   ;;  %s996_s5 = inlined_call_operand.vmem [shape: f32[8,32], index: 5, kind: input, shape index: {}]   ;;  %s997_s7 = inlined_call_operand.vmem [shape: f32[8,128], index: 7, kind: output, shape index: {}]  }
   0x1   :  { %v26_v0 = vld [vmem:[%s990_s0] sm:$0xff]  ;;  %v27_v1 = vld [vmem:[%s990_s0 + $0x8] sm:$0xff]  ;;  %vm819_vm1 = vmpackc.low %vm98_vm0, %vm98_vm0  ;;  %749 = vset.pattern.permute.xlu0 %v767_v3  ;;  %750 = vset.pattern.permute.xlu1 %v767_v3  ;;  %vm449_vm4 = vcmask 261120  }
   0x2   :  { %v675_v4 = vpack.c.bf16 %v27_v1, %v26_v0  ;;  %v28_v5 = vld [vmem:[%s990_s0 + $0x10] sm:$0xff]  ;;  %v29_v6 = vld [vmem:[%s990_s0 + $0x18] sm:$0xff]  ;;  %v42_v8 = vld [vmem:[%s991_s1] sm:$0xff] }
   0x3   :  { %v681_v7 = vpack.c.bf16 %v29_v6, %v28_v5  ;;  %v30_v9 = vld [vmem:[%s990_s0 + $0x20] sm:$0xff]  ;;  %v31_v10 = vld [vmem:[%s990_s0 + $0x28] sm:$0xff]  ;;  %630 = vmatprep.mubr.msk.f32.mxu0 %vm98_vm0, %v42_v8  ;;  %v52_v13 = vld [vmem:[%s992_s2 + $0x10] sm:$0xff] }
   0x4   :  { %677 = vmatprep.subr.msk.bf16.mxu0 %vm819_vm1, %v675_v4  ;;  %v50_v11 = vld [vmem:[%s992_s2] sm:$0xff]  ;;  %v687_v12 = vpack.c.bf16 %v31_v10, %v30_v9  ;;  %v51_v14 = vld [vmem:[%s992_s2 + $0x8] sm:$0xff]  ;;  %70 = vperm.xlu1 %750, %v52_v13   ;;  %v53_v15 = vld [vmem:[%s992_s2 + $0x18] sm:$0xff] }
   0x5   :  { %680 = vmatpush3.bf16.xpose.msk.msra.mxu0 %vm819_vm1, %v675_v4  ;;  %60 = vperm.xlu0 %749, %v50_v11   ;;  %v32_v16 = vld [vmem:[%s990_s0 + $0x30] sm:$0xff]  ;;  %v33_v17 = vld [vmem:[%s990_s0 + $0x38] sm:$0xff]  ;;  %v54_v18 = vld [vmem:[%s992_s2 + $0x20] sm:$0xff] }
   0x6   :  { %683 = vmatprep.subr.msk.bf16.mxu0 %vm819_vm1, %v681_v7  ;;  %v55_v19 = vld [vmem:[%s992_s2 + $0x28] sm:$0xff]  ;;  %v693_v20 = vpack.c.bf16 %v33_v17, %v32_v16  ;;  %v56_v21 = vld [vmem:[%s992_s2 + $0x30] sm:$0xff]  ;;  %v57_v22 = vld [vmem:[%s992_s2 + $0x38] sm:$0xff] }
   0x7   :  { %v34_v23 = vld [vmem:[%s990_s0 + $0x40] sm:$0xff]  ;;  %v35_v24 = vld [vmem:[%s990_s0 + $0x48] sm:$0xff]  ;;  %v298_v28 = vld [vmem:[%s993_s4 + $0x10] sm:$0xff] }
   0x8   :  { %75 = vperm.xlu1 %750, %v53_v15   ;;  %v296_v25 = vld [vmem:[%s993_s4] sm:$0xff]  ;;  %v297_v26 = vld [vmem:[%s993_s4 + $0x8] sm:$0xff]  ;;  %v699_v27 = vpack.c.bf16 %v35_v24, %v34_v23  ;;  %v299_v29 = vld [vmem:[%s993_s4 + $0x18] sm:$0xff] }
   0x9   :  { %65 = vperm.xlu0 %749, %v51_v14   ;;  %v36_v30 = vld [vmem:[%s990_s0 + $0x50] sm:$0xff]  ;;  %v37_v31 = vld [vmem:[%s990_s0 + $0x58] sm:$0xff]  ;;  %v443_v32 = vld [vmem:[%s994_s6] sm:$0xff] }
   0xa   :  { %v705_v33 = vpack.c.bf16 %v37_v31, %v36_v30  ;;  %v38_v34 = vld [vmem:[%s990_s0 + $0x60] sm:$0xff]  ;;  %v39_v35 = vld [vmem:[%s990_s0 + $0x68] sm:$0xff]  ;;  %v40_v37 = vld [vmem:[%s990_s0 + $0x70] sm:$0xff]  ;;  %v768_v31 = vmov 0.0|0.0  }
   0xb   :  { %v711_v36 = vpack.c.bf16 %v39_v35, %v38_v34  ;;  %v41_v38 = vld [vmem:[%s990_s0 + $0x78] sm:$0xff]  ;;  %v43_v40 = vld [vmem:[%s991_s1 + $0x8] sm:$0xff]  ;;  %v44_v41 = vld [vmem:[%s991_s1 + $0x10] sm:$0xff] }
   0xc   :  { %85 = vperm.xlu1 %750, %v55_v19   ;;  %v717_v39 = vpack.c.bf16 %v41_v38, %v40_v37  ;;  %v45_v42 = vld [vmem:[%s991_s1 + $0x18] sm:$0xff]  ;;  %v46_v43 = vld [vmem:[%s991_s1 + $0x20] sm:$0xff]  ;;  %v47_v44 = vld [vmem:[%s991_s1 + $0x28] sm:$0xff] }
   0xd   :  { %686 = vmatpush3.bf16.xpose.msk.msra.mxu0 %vm819_vm1, %v681_v7  ;;  %80 = vperm.xlu0 %749, %v54_v18   ;;  %v48_v45 = vld [vmem:[%s991_s1 + $0x30] sm:$0xff]  ;;  %v49_v46 = vld [vmem:[%s991_s1 + $0x38] sm:$0xff]  ;;  %v292_v47 = vld [vmem:[%s995_s3] sm:$0xff] }
   0xe   :  { %689 = vmatprep.subr.msk.bf16.mxu0 %vm819_vm1, %v687_v12  ;;  %658 = vmatprep.mubr.msk.f32.mxu1 %vm320_vm2, %v292_v47  ;;  %v295_v30 = vld [vmem:[%s995_s3 + $0x18] sm:$0xff] }
  0x10   :  { %95 = vperm.xlu1 %750, %v57_v22  }
  0x11   :  { %90 = vperm.xlu0 %749, %v56_v21  }
  0x14   :  { %307 = vperm.xlu1 %750, %v297_v26  }
  0x15   :  { %692 = vmatpush3.bf16.xpose.msk.msra.mxu0 %vm819_vm1, %v687_v12  ;;  %302 = vperm.xlu0 %749, %v296_v25  }
  0x16   :  { %695 = vmatprep.subr.msk.bf16.mxu0 %vm819_vm1, %v693_v20 }
  0x18   :  { %317 = vperm.xlu1 %750, %v299_v29   ;;  %v294_v29 = vld [vmem:[%s995_s3 + $0x10] sm:$0xff] }
  0x19   :  { %312 = vperm.xlu0 %749, %v298_v28   ;;  %v293_v28 = vld [vmem:[%s995_s3 + $0x8] sm:$0xff] }
  0x1d   :  { %698 = vmatpush3.bf16.xpose.msk.msra.mxu0 %vm819_vm1, %v693_v20  ;;  %446 = vperm.xlu0 %749, %v443_v32   ;;  %v770_v32 = vmov 0.0  }
  0x1e   :  { %701 = vmatprep.subr.msk.bf16.mxu0 %vm819_vm1, %v699_v27 }
  0x25   :  { %704 = vmatpush3.bf16.xpose.msk.msra.mxu0 %vm819_vm1, %v699_v27 }
  0x26   :  { %707 = vmatprep.subr.msk.bf16.mxu0 %vm819_vm1, %v705_v33 }
  0x2d   :  { %710 = vmatpush3.bf16.xpose.msk.msra.mxu0 %vm819_vm1, %v705_v33 }
  0x2e   :  { %713 = vmatprep.subr.msk.bf16.mxu0 %vm819_vm1, %v711_v36 }
  0x35   :  { %716 = vmatpush3.bf16.xpose.msk.msra.mxu0 %vm819_vm1, %v711_v36 }
  0x36   :  { %719 = vmatprep.subr.msk.bf16.mxu0 %vm819_vm1, %v717_v39 }
  0x3d   :  { %722 = vmatpush3.bf16.xpose.msk.msra.mxu0 %vm819_vm1, %v717_v39 }
  0x44   :  { %631 = vmatmul.mubr.msk.f32.vlgmr.msra.gmra.mrb[0].mxu0 %vm98_vm0, %v43_v40 }
  0x45   :  { %633 = vmatprep.mubr.msk.f32.mxu0 %vm98_vm0, %v44_v41 }
  0x48   :  { %634 = vmatmul.mubr.msk.f32.gmra.mrb[2].mxu0 %vm98_vm0, %v45_v42 }
  0x49   :  { %636 = vmatprep.mubr.msk.f32.mxu0 %vm98_vm0, %v46_v43 }
  0x4c   :  { %637 = vmatmul.mubr.msk.f32.gmra.mrb[4].mxu0 %vm98_vm0, %v47_v44 }
  0x4d   :  { %639 = vmatprep.mubr.msk.f32.mxu0 %vm98_vm0, %v48_v45 }
  0x50   :  { %640 = vmatmul.mubr.msk.f32.gmra.mrb[6].mxu0 %vm98_vm0, %v49_v46 }
  0x83   :  { %v71_v49 = vpop.permute.xlu1 %70 }
  0x84   :  { %v61_v48 = vpop.permute.xlu0 %60 }
  0x87   :  { %v76_v51 = vpop.permute.xlu1 %75 }
  0x88   :  { %v66_v50 = vpop.permute.xlu0 %65 }
  0x8b   :  { %v86_v62 = vpop.permute.xlu1 %85 }
  0x8c   :  { %v81_v1 = vpop.permute.xlu0 %80 }
  0x8f   :  { %v96_v12 = vpop.permute.xlu1 %95 }
  0x90   :  { %v91_v16 = vpop.permute.xlu0 %90 }
  0x93   :  { %v308_v33 = vpop.permute.xlu1 %307 }
  0x94   :  { %v303_v34 = vpop.permute.xlu0 %302 }
  0x97   :  { %v318_v40 = vpop.permute.xlu1 %317 }
  0x98   :  { %v313_v43 = vpop.permute.xlu0 %312 }
 0x117   :  { %v632_v52 = vpop.f32.mrb[0].mxu0 }
 0x118   :  { %v243_v53 = vadd.f32 %v632_v52, %v66_v50  ;;  %v237_v54 = vpop.f32.mrb[1].mxu0 }
 0x119   :  { %v238_v55 = vadd.f32 %v237_v54, %v61_v48 }
 0x11a   :  { %v277_v56 = vmul.f32 0.01, %v243_v53 }
 0x11b   :  { %v276_v57 = vmul.f32 0.01, %v238_v55  ;;  %v635_v58 = vpop.f32.mrb[2].mxu0 }
 0x11c   :  { %v285_v59 = vmax.f32 %v243_v53, %v277_v56  ;;  %v253_v60 = vadd.f32 %v635_v58, %v76_v51  ;;  %v247_v61 = vpop.f32.mrb[3].mxu0 }
 0x11d   :  { %v284_v63 = vmax.f32 %v238_v55, %v276_v57  ;;  %v248_v0 = vadd.f32 %v247_v61, %v71_v49 }
 0x11e   :  { %v279_v2 = vmul.f32 0.01, %v253_v60 }
 0x11f   :  { %v278_v3 = vmul.f32 0.01, %v248_v0  ;;  %v638_v4 = vpop.f32.mrb[4].mxu0  ;;  %v723_v5 = vpack.c.bf16 %v285_v59, %v284_v63 }
 0x120   :  { %v287_v6 = vmax.f32 %v253_v60, %v279_v2  ;;  %v263_v7 = vadd.f32 %v638_v4, %v86_v62  ;;  %v257_v8 = vpop.f32.mrb[5].mxu0  ;;  %v447_v4 = vpop.permute.xlu0 %446 }
 0x121   :  { %v286_v9 = vmax.f32 %v248_v0, %v278_v3  ;;  %v258_v10 = vadd.f32 %v257_v8, %v81_v1  ;;  %724 = vmatprep.subr.bf16.mxu1 %v723_v5  ;;  %v442_v3 = vld [vmem:[%s996_s5] sm:$0xff] }
 0x122   :  { %v281_v11 = vmul.f32 0.01, %v263_v7  ;;  %726 = vmatpush3.bf16.msra.mxu1 %v723_v5 }
 0x123   :  { %v280_v13 = vmul.f32 0.01, %v258_v10  ;;  %v641_v14 = vpop.f32.mrb[6].mxu0  ;;  %v727_v15 = vpack.c.bf16 %v287_v6, %v286_v9 }
 0x124   :  { %v289_v17 = vmax.f32 %v263_v7, %v281_v11  ;;  %v273_v18 = vadd.f32 %v641_v14, %v96_v12  ;;  %v267_v19 = vpop.f32.mrb[7].mxu0 }
 0x125   :  { %v288_v20 = vmax.f32 %v258_v10, %v280_v13  ;;  %v268_v21 = vadd.f32 %v267_v19, %v91_v16  ;;  %728 = vmatprep.subr.bf16.mxu1 %v727_v15 }
 0x126   :  { %v283_v22 = vmul.f32 0.01, %v273_v18  ;;  %730 = vmatpush3.bf16.msra.mxu1 %v727_v15 }
 0x127   :  { %v282_v23 = vmul.f32 0.01, %v268_v21  ;;  %v731_v24 = vpack.c.bf16 %v289_v17, %v288_v20 }
 0x128   :  { %v291_v25 = vmax.f32 %v273_v18, %v283_v22 }
 0x129   :  { %v290_v26 = vmax.f32 %v268_v21, %v282_v23  ;;  %732 = vmatprep.subr.bf16.mxu1 %v731_v24 }
 0x12a   :  { %734 = vmatpush3.bf16.msra.mxu1 %v731_v24 }
 0x12b   :  { %v735_v27 = vpack.c.bf16 %v291_v25, %v290_v26 }
 0x12d   :  { %736 = vmatprep.subr.bf16.mxu1 %v735_v27 }
 0x12e   :  { %738 = vmatpush3.bf16.msra.mxu1 %v735_v27 }
 0x12f   :  { %739 = vmatprep.subr.bf16.mxu1 %v768_v31 }
 0x131   :  { %659 = vmatmul.mubr.msk.f32.vlgmr.msra.gmra.mrb[0].mxu1 %vm320_vm2, %v293_v28 }
 0x132   :  { %661 = vmatprep.mubr.msk.f32.mxu1 %vm320_vm2, %v294_v29 }
 0x135   :  { %662 = vmatmul.mubr.msk.f32.gmra.mrb[2].mxu1 %vm320_vm2, %v295_v30 }
 0x136   :  { %672 = vmatprep.mubr.msk.f32.mxu1 %vm769_vm3, %v770_v32 }
 0x204   :  { %v660_v35 = vpop.f32.mrb[0].mxu1 }
 0x205   :  { %v405_v36 = vadd.f32 %v660_v35, %v308_v33  ;;  %v399_v37 = vpop.f32.mrb[1].mxu1 }
 0x206   :  { %v400_v38 = vadd.f32 %v399_v37, %v303_v34 }
 0x207   :  { %v419_v39 = vsub.f32 0.0, %v405_v36 }
 0x208   :  { %v418_v41 = vsub.f32 0.0, %v400_v38  ;;  %v663_v42 = vpop.f32.mrb[2].mxu1 }
 0x209   :  { %v424_v44 = vmul.f32 1.442695, %v419_v39  ;;  %v415_v45 = vadd.f32 %v663_v42, %v318_v40  ;;  %v409_v46 = vpop.f32.mrb[3].mxu1 }
 0x20a   :  { %v422_v47 = vmul.f32 1.442695, %v418_v41  ;;  %v410_v48 = vadd.f32 %v409_v46, %v313_v43 }
 0x20b   :  { %751 = vpow2.f32 %v424_v44  ;;  %v421_v49 = vsub.f32 0.0, %v415_v45 }
 0x20c   :  { %753 = vpow2.f32 %v422_v47  ;;  %v420_v50 = vsub.f32 0.0, %v410_v48 }
 0x20d   :  { %v428_v51 = vmul.f32 1.442695, %v421_v49 }
 0x20e   :  { %v426_v52 = vmul.f32 1.442695, %v420_v50 }
 0x20f   :  { %755 = vpow2.f32 %v428_v51 }
 0x210   :  { %757 = vpow2.f32 %v426_v52 }
 0x215   :  { %v752_v53 = vpop.eup %751 }
 0x216   :  { %v754_v54 = vpop.eup %753  ;;  %v431_v55 = vadd.f32 1.0, %v752_v53 }
 0x217   :  { %v430_v56 = vadd.f32 1.0, %v754_v54 }
 0x218   :  { %759 = vrcp.f32 %v431_v55 }
 0x219   :  { %v756_v57 = vpop.eup %755  ;;  %761 = vrcp.f32 %v430_v56 }
 0x21a   :  { %v758_v58 = vpop.eup %757  ;;  %v433_v59 = vadd.f32 1.0, %v756_v57 }
 0x21b   :  { %v432_v60 = vadd.f32 1.0, %v758_v58 }
 0x21c   :  { %763 = vrcp.f32 %v433_v59 }
 0x21d   :  { %765 = vrcp.f32 %v432_v60 }
 0x222   :  { %v760_v61 = vpop.eup %759 }
 0x223   :  { %v762_v62 = vpop.eup %761 }
 0x224   :  { %v740_v63 = vpack.c.bf16 %v760_v61, %v762_v62 }
 0x226   :  { %v764_v0 = vpop.eup %763  ;;  %741 = vmatpush3.bf16.msra.mxu1 %v740_v63 }
 0x227   :  { %v766_v1 = vpop.eup %765  ;;  %742 = vmatprep.subr.bf16.mxu1 %v768_v31 }
 0x228   :  { %v743_v2 = vpack.c.bf16 %v764_v0, %v766_v1 }
 0x22a   :  { %744 = vmatpush3.bf16.msra.mxu1 %v743_v2 }
 0x22d   :  { %673 = vmatmul.mubr.msk.f32.vlgmr.msra.gmra.mrb[4].mxu1 %vm449_vm4, %v442_v3 }
 0x300   :  { %v519_v5 = vpop.f32.mrb[4].mxu1 }
 0x301   :  { %v520_v6 = vadd.f32 %v519_v5, %v447_v4  ;;  %v674_v7 = vpop.f32.mrb[5].mxu1 }
 0x303   :  { %523 = vst [vmem:[%s997_s7] sm:$0xff] %v520_v6 }

</bundles_post_ra>
